<compile_context>
chip_gen: v5e
topology: v5e:2x2
jax: 0.10.0
libtpu: 0.0.40
codegen_flags: <defaults>
</compile_context>

<pallas_src>
import functools

import jax
import jax.numpy as jnp
from jax.experimental import pallas as pl
from jax.experimental.pallas import tpu as pltpu


def _interp_matrix(in_size, out_size, align_corners=False):
    """1-D linear interpolation matrix (out_size, in_size) matching PyTorch
    F.interpolate(mode='trilinear') source-index semantics."""
    idx = jnp.arange(out_size, dtype=jnp.float32)
    if align_corners:
        if out_size > 1:
            src = idx * (in_size - 1) / (out_size - 1)
        else:
            src = jnp.zeros((out_size,), jnp.float32)
    else:
        scale = in_size / out_size
        src = jnp.maximum(scale * (idx + 0.5) - 0.5, 0.0)
    i0 = jnp.clip(jnp.floor(src), 0, in_size - 1).astype(jnp.int32)
    i1 = jnp.minimum(i0 + 1, in_size - 1)
    lam = src - i0.astype(jnp.float32)
    rows = jnp.arange(out_size)
    M = jnp.zeros((out_size, in_size), jnp.float32)
    M = M.at[rows, i0].add(1.0 - lam)
    M = M.at[rows, i1].add(lam)
    return M


def _fused_kernel(x_ref, wd_ref, brow_ref, khwT_ref, o_ref):
    """Fused 1x1x1-conv + trilinear-upsample for one (batch, cout-block) tile.

    x_ref    : (1, Cin*D, H*W)            VMEM  input slab (one batch)
    wd_ref   : (cout_block*Do, Cin*D)     VMEM  kron(conv weight, depth-interp)
    brow_ref : (cout_block*Do, 1)         VMEM  per-(channel,depth-row) bias
    khwT_ref : (H*W, Ho*Wo)               VMEM  (Mh ⊗ Mw)^T  HW-interp matrix
    o_ref    : (1, cout_block*Do, Ho*Wo)  VMEM  output slab
    """
    x = x_ref[0]                                                        # (Cin*D, H*W)
    # conv + depth interpolation in one MXU matmul
    y = jnp.dot(wd_ref[...], x, preferred_element_type=jnp.float32)    # (cb*Do, H*W)
    # (H, W) interpolation in one MXU matmul
    o = jnp.dot(y, khwT_ref[...], preferred_element_type=jnp.float32)  # (cb*Do, Ho*Wo)
    # single store of the whole tile, bias broadcast over the lane dim
    o_ref[0] = (o + brow_ref[...]).astype(o_ref.dtype)


def _pick_cout_block(cout, n):
    """Largest divisor of Cout <= 8, shrunk if needed so the grid has >= 2
    parallel steps (v7x has 2 TensorCores per chip)."""
    cb = 1
    for c in range(min(8, cout), 0, -1):
        if cout % c == 0:
            cb = c
            break
    if n * (cout // cb) < 2:
        for c in range(cb - 1, 0, -1):
            if cout % c == 0 and n * (cout // c) >= 2:
                cb = c
                break
    return cb


def upsample_conv_forward(x, weight, bias, size, align_corners=False):
    """x: (N, Cin, D, H, W) NCDHW; weight: (Cout, Cin, 1, 1, 1); bias: (Cout,)
    Returns (N, Cout, Do, Ho, Wo) float32 (matches Conv3d(k=1) -> Upsample(trilinear))."""
    N, Cin, D, H, W = x.shape
    Cout = weight.shape[0]
    Do, Ho, Wo = size
    HW, HoWo = H * W, Ho * Wo
    CinD = Cin * D

    cout_block = _pick_cout_block(Cout, N)
    ncb = Cout // cout_block

    # Host-side constants (built once).
    w2 = weight.reshape(Cout, Cin).astype(jnp.float32)          # (Cout, Cin)
    Md = _interp_matrix(D, Do, align_corners)                   # (Do, D)
    Mh = _interp_matrix(H, Ho, align_corners)                   # (Ho, H)
    Mw = _interp_matrix(W, Wo, align_corners)                   # (Wo, W)

    # Fold conv weight and depth-interp into one matrix:
    #   Wd[co*Do + a, ci*D + d] = w2[co, ci] * Md[a, d]
    Wd = jnp.kron(w2, Md)                                       # (Cout*Do, Cin*D)
    # HW interpolation (transposed Kronecker).  Fine at this scale; see TODO above.
    khwT = jnp.kron(Mh, Mw).T                                   # (H*W, Ho*Wo)
    # Bias repeated across the Do depth rows of each output channel.
    brow = jnp.repeat(bias.astype(jnp.float32), Do).reshape(Cout * Do, 1)

    # Free (contiguous) reshape only — no XLA transposes.
    x2 = x.reshape(N, CinD, HW).astype(jnp.float32)

    out = pl.pallas_call(
        _fused_kernel,
        out_shape=jax.ShapeDtypeStruct((N, Cout * Do, HoWo), jnp.float32),
        grid=(N, ncb),
        in_specs=[
            # x: independent of j -> DMA skipped across the cout-block axis.
            pl.BlockSpec((1, CinD, HW), lambda n, j: (n, 0, 0)),
            pl.BlockSpec((cout_block * Do, CinD), lambda n, j: (j, 0)),
            pl.BlockSpec((cout_block * Do, 1), lambda n, j: (j, 0)),
            pl.BlockSpec((HW, HoWo), lambda n, j: (0, 0)),
        ],
        out_specs=pl.BlockSpec((1, cout_block * Do, HoWo), lambda n, j: (n, j, 0)),
        compiler_params=pltpu.CompilerParams(
            dimension_semantics=("parallel", "parallel"),
            vmem_limit_bytes=32 * 1024 * 1024,
        ),
    )(x2, Wd, brow, khwT)

    # Free reshape back to NCDHW output layout.
    return out.reshape(N, Cout, Do, Ho, Wo)


if __name__ == "__main__":
    key = jax.random.PRNGKey(0)
    k1, k2, k3 = jax.random.split(key, 3)

    # Small shapes consistent with the module: NCDHW input, upsample to size=(12,12,12)
    N, Cin, Cout = 2, 4, 8
    D = H = W = 8
    size = (12, 12, 12)
    align_corners = False

    x = jax.random.normal(k1, (N, Cin, D, H, W), jnp.float32)
    weight = 0.1 * jax.random.normal(k2, (Cout, Cin, 1, 1, 1), jnp.float32)
    bias = 0.1 * jax.random.normal(k3, (Cout,), jnp.float32)

    out = upsample_conv_forward(x, weight, bias, size, align_corners)
    out = jax.block_until_ready(out)
    assert out.shape == (N, Cout) + size, out.shape

    # Pure-JAX reference (conv then trilinear interp via the same matrices).
    w2 = weight.reshape(Cout, Cin)
    y_ref = jnp.einsum("ncdhw,oc->nodhw", x, w2) + bias[None, :, None, None, None]
    Md = _interp_matrix(D, size[0], align_corners)
    Mh = _interp_matrix(H, size[1], align_corners)
    Mw = _interp_matrix(W, size[2], align_corners)
    ref = jnp.einsum("ad,bh,ew,nodhw->noabe", Md, Mh, Mw, y_ref)
    err = float(jnp.max(jnp.abs(out - ref)))
    assert jnp.allclose(out, ref, atol=1e-4, rtol=1e-4), err

    print("KERNEL_OK")
</pallas_src>

<mosaic_0001>
module attributes {stable_mosaic.version = 11 : i64} {
  func.func @_fused_kernel(%arg0: i32, %arg1: i32, %arg2: memref<1x32x64xf32, #tpu.memory_space<vmem>>, %arg3: memref<96x32xf32, #tpu.memory_space<vmem>>, %arg4: memref<96x1xf32, #tpu.memory_space<vmem>>, %arg5: memref<64x144xf32, #tpu.memory_space<vmem>>, %arg6: memref<1x96x144xf32, #tpu.memory_space<vmem>>) attributes {dimension_semantics = [#tpu.dimension_semantics<parallel>, #tpu.dimension_semantics<parallel>], iteration_bounds = array<i64: 2, 1>, scalar_prefetch = 0 : i64, scratch_operands = 0 : i64, tpu.core_type = #tpu.core_type<tc>, window_params = [{transform_indices = @transform_0, window_bounds = array<i64: 1, 32, 64>}, {transform_indices = @transform_1, window_bounds = array<i64: 96, 32>}, {transform_indices = @transform_2, window_bounds = array<i64: 96, 1>}, {pipeline_mode = #tpu.pipeline_mode<synchronous>, transform_indices = @transform_3, window_bounds = array<i64: 64, 144>}, {transform_indices = @transform_4, window_bounds = array<i64: 1, 96, 144>}]} {
    %c0 = arith.constant 0 : index
    %c0_0 = arith.constant 0 : index
    %c0_1 = arith.constant 0 : index
    %0 = vector.load %arg2[%c0, %c0_0, %c0_1] : memref<1x32x64xf32, #tpu.memory_space<vmem>>, vector<1x32x64xf32>
    %1 = vector.shape_cast %0 : vector<1x32x64xf32> to vector<32x64xf32>
    %c0_2 = arith.constant 0 : index
    %c0_3 = arith.constant 0 : index
    %2 = vector.load %arg3[%c0_2, %c0_3] : memref<96x32xf32, #tpu.memory_space<vmem>>, vector<96x32xf32>
    %cst = arith.constant dense<0.000000e+00> : vector<96x64xf32>
    %3 = tpu.matmul %2, %1, %cst {dimension_numbers = #tpu.dot_dimension_numbers<[1], [0], [0], [1], [0, 0, 1, 1], [], []>} : vector<96x32xf32>, vector<32x64xf32>, vector<96x64xf32> -> vector<96x64xf32>
    %c0_4 = arith.constant 0 : index
    %c0_5 = arith.constant 0 : index
    %4 = vector.load %arg5[%c0_4, %c0_5] : memref<64x144xf32, #tpu.memory_space<vmem>>, vector<64x144xf32>
    %cst_6 = arith.constant dense<0.000000e+00> : vector<96x144xf32>
    %5 = tpu.matmul %3, %4, %cst_6 {dimension_numbers = #tpu.dot_dimension_numbers<[1], [0], [0], [1], [0, 0, 1, 1], [], []>} : vector<96x64xf32>, vector<64x144xf32>, vector<96x144xf32> -> vector<96x144xf32>
    %c0_7 = arith.constant 0 : index
    %c0_8 = arith.constant 0 : index
    %6 = vector.load %arg4[%c0_7, %c0_8] : memref<96x1xf32, #tpu.memory_space<vmem>>, vector<96x1xf32>
    %7 = vector.broadcast %6 : vector<96x1xf32> to vector<96x144xf32>
    %8 = arith.addf %5, %7 : vector<96x144xf32>
    %c0_9 = arith.constant 0 : index
    %c0_10 = arith.constant 0 : index
    %c0_11 = arith.constant 0 : index
    %9 = vector.load %arg6[%c0_9, %c0_10, %c0_11] : memref<1x96x144xf32, #tpu.memory_space<vmem>>, vector<1x96x144xf32>
    %10 = vector.shape_cast %9 : vector<1x96x144xf32> to vector<96x144xf32>
    %11 = vector.shape_cast %8 : vector<96x144xf32> to vector<1x96x144xf32>
    tpu.vector_store %arg6[%c0_9, %c0_10, %c0_11], %11 {strides = array<i32>} : memref<1x96x144xf32, #tpu.memory_space<vmem>>, vector<1x96x144xf32>,
    return
  }
  func.func @transform_0(%arg0: i32, %arg1: i32) -> (i32, i32, i32) {
    %c0_i32 = arith.constant 0 : i32
    %c0_i32_0 = arith.constant 0 : i32
    %c0_i32_1 = arith.constant 0 : i32
    return %arg0, %c0_i32, %c0_i32_0 : i32, i32, i32
  }
  func.func @transform_1(%arg0: i32, %arg1: i32) -> (i32, i32) {
    %c0_i32 = arith.constant 0 : i32
    %c0_i32_0 = arith.constant 0 : i32
    return %arg1, %c0_i32 : i32, i32
  }
  func.func @transform_2(%arg0: i32, %arg1: i32) -> (i32, i32) {
    %c0_i32 = arith.constant 0 : i32
    %c0_i32_0 = arith.constant 0 : i32
    return %arg1, %c0_i32 : i32, i32
  }
  func.func @transform_3(%arg0: i32, %arg1: i32) -> (i32, i32) {
    %c0_i32 = arith.constant 0 : i32
    %c0_i32_0 = arith.constant 0 : i32
    %c0_i32_1 = arith.constant 0 : i32
    return %c0_i32, %c0_i32_0 : i32, i32
  }
  func.func @transform_4(%arg0: i32, %arg1: i32) -> (i32, i32, i32) {
    %c0_i32 = arith.constant 0 : i32
    %c0_i32_0 = arith.constant 0 : i32
    return %arg0, %arg1, %c0_i32 : i32, i32, i32
  }
}

</mosaic_0001>

<bundles_post_ra>
// kernel: tpu_custom_call.1
= control target key start
LH: loop header
LB: loop body
LE: loop exit
PB: predicated region body
PF: predicated region fallthrough
CT: control target
= control target key end

     0   :  { %s894_s15 = smov 0   ;;  %s896_s16 = smov 0   ;;  %s1125_s0 = inlined_call_operand.vmem [shape: f32[2,32,64], index: 0, kind: input, shape index: {}]   ;;  %s1126_s1 = inlined_call_operand.vmem [shape: f32[96,32], index: 1, kind: input, shape index: {}]   ;;  %s1127_s2 = inlined_call_operand.vmem [shape: f32[96,1], index: 2, kind: input, shape index: {}]   ;;  %s1128_s3 = inlined_call_operand.vmem [shape: f32[64,144], index: 3, kind: input, shape index: {}]   ;;  %s1129_s4 = inlined_call_operand.vmem [shape: f32[2,96,144], index: 4, kind: output, shape index: {}]  }
   0x1   :  { %s898_s17 = smov 0  }
   0x2 LB: > { %s26_s18 = sadd.s32 1, %s862_s16  ;;  %p752_p0 = scmp.ge.s32.totalorder %s866_s17, 1  ;;  %s866_s17 = sphi %s898_s17, %s14_s17   ;;  %s862_s16 = sphi %s896_s16, %s1131_s16   ;;  %s858_s15 = sphi %s894_s15, %s1130_s15  }
   0x3   : > { %p28_p1 = scmp.ge.s32.totalorder %s26_s18, 2  ;;  %p198_p2 = scmp.lt.s32.totalorder %s866_s17, 3 }
   0x5   : > { %s1133_s18 = smov (%p28_p1, %s26_s18), 0  ;;  %p199_p3 = pnand %p752_p0, %p198_p2 }
   0x6   : > { %p239_p4 = scmp.lt.s32.totalorder (!%p199_p3), %s858_s15, 1 }
   0x7   : > { %202 = sbr.rel (%p199_p3) target bundleno = 396 (0x18c), region = 36 }
   0xc   : > { %s1135_s15 = smov (!%p239_p4, %s858_s15), 1  ;;  %v271_v4 = vld [vmem:[%s1126_s1] sm:$0xff]  ;;  %vm283_vm0 = vcmask 261120   ;;  %v272_v5 = vld [vmem:[%s1126_s1 + $0x8] sm:$0xff]  ;;  %v273_v6 = vld [vmem:[%s1126_s1 + $0x10] sm:$0xff]  ;;  %v868_v33 = vmov 0  }
   0xd   : > { %s794_s19 = sshll.u32 %s1135_s15, 5  ;;  %v274_v7 = vld [vmem:[%s1126_s1 + $0x18] sm:$0xff]  ;;  %v275_v8 = vld [vmem:[%s1126_s1 + $0x20] sm:$0xff]  ;;  %v276_v9 = vld [vmem:[%s1126_s1 + $0x28] sm:$0xff]  ;;  %841 = vset.pattern.permute.xlu0 %v868_v33  ;;  %842 = vset.pattern.permute.xlu1 %v868_v33  ;;  %vm461_vm1 = vcmask 523264   ;;  %s815_s11 = smul.u32 192, %s1135_s15 }
   0xe   : > { %s243_s22 = scalar_lea.vmem %s1125_s0, %s794_s19  ;;  %v281_v10 = vld [vmem:[%s1126_s1 + $0x50] sm:$0xff]  ;;  %v388_v12 = vld [vmem:[%s1128_s3 + $0x78] sm:$0xff]  ;;  %v385_v13 = vld [vmem:[%s1128_s3 + $0x60] sm:$0xff]  ;;  %843 = vset.pattern.permute.xlu2 %v868_v33  ;;  %vm605_vm2 = vcmask 130048  }
   0xf   : > { %v270_v0 = vld [vmem:[%s243_s22 + $0x18] sm:$0xff]  ;;  %v269_v1 = vld [vmem:[%s243_s22 + $0x10] sm:$0xff]  ;;  %v268_v2 = vld [vmem:[%s243_s22 + $0x8] sm:$0xff]  ;;  %559 = vmatpush.msra.mxu2 %v388_v12  ;;  %s1078_s14 = scalar_lea.vmem %s1129_s4, %s815_s11 }
  0x10   : > { %332 = vmatpush.msra.mxu0 %v270_v0  ;;  %795 = vmatpush.msra.mxu3 %v270_v0  ;;  %v267_v3 = vld [vmem:[%s243_s22] sm:$0xff]  ;;  %v387_v11 = vld [vmem:[%s1128_s3 + $0x70] sm:$0xff]  ;;  %v386_v14 = vld [vmem:[%s1128_s3 + $0x68] sm:$0xff] }
  0x11   : > { %506 = vmatpush.msra.mxu1 %v387_v11  ;;  %v383_v15 = vld [vmem:[%s1128_s3 + $0x50] sm:$0xff]  ;;  %v384_v16 = vld [vmem:[%s1128_s3 + $0x58] sm:$0xff]  ;;  %560 = vmatpush.msra.mxu2 %v386_v14  ;;  %v381_v17 = vld [vmem:[%s1128_s3 + $0x40] sm:$0xff] }
  0x12   : > { %333 = vmatpush.msra.mxu0 %v269_v1  ;;  %796 = vmatpush.msra.mxu3 %v269_v1  ;;  %v277_v18 = vld [vmem:[%s1126_s1 + $0x30] sm:$0xff]  ;;  %v382_v19 = vld [vmem:[%s1128_s3 + $0x48] sm:$0xff]  ;;  %v282_v20 = vld [vmem:[%s1126_s1 + $0x58] sm:$0xff] }
  0x13   : > { %507 = vmatpush.msra.mxu1 %v385_v13  ;;  %561 = vmatpush.msra.mxu2 %v384_v16  ;;  %v379_v21 = vld [vmem:[%s1128_s3 + $0x30] sm:$0xff]  ;;  %v380_v22 = vld [vmem:[%s1128_s3 + $0x38] sm:$0xff]  ;;  %v377_v23 = vld [vmem:[%s1128_s3 + $0x20] sm:$0xff] }
  0x14   : > { %334 = vmatpush.msra.mxu0 %v268_v2  ;;  %797 = vmatpush.msra.mxu3 %v268_v2  ;;  %v378_v24 = vld [vmem:[%s1128_s3 + $0x28] sm:$0xff]  ;;  %v375_v25 = vld [vmem:[%s1128_s3 + $0x10] sm:$0xff]  ;;  %v376_v26 = vld [vmem:[%s1128_s3 + $0x18] sm:$0xff] }
  0x15   : > { %508 = vmatpush.msra.mxu1 %v383_v15  ;;  %562 = vmatpush.msra.mxu2 %v382_v19  ;;  %v278_v27 = vld [vmem:[%s1126_s1 + $0x38] sm:$0xff]  ;;  %v279_v28 = vld [vmem:[%s1126_s1 + $0x40] sm:$0xff]  ;;  %v280_v29 = vld [vmem:[%s1126_s1 + $0x48] sm:$0xff] }
  0x16   : > { %335 = vmatpush.msra.mxu0 %v267_v3  ;;  %798 = vmatpush.msra.mxu3 %v267_v3  ;;  %v373_v30 = vld [vmem:[%s1128_s3] sm:$0xff]  ;;  %v374_v31 = vld [vmem:[%s1128_s3 + $0x8] sm:$0xff]  ;;  %v391_v35 = vld [vmem:[%s1127_s2 + $0x10] sm:$0xff] }
  0x17   : > { %756 = vmatmul.msk.f32.vlgmr.msra.gmra.mxu0 %vm283_vm0, %v271_v4  ;;  %766 = vmatmul.msk.f32.vlgmr.msra.gmra.mxu3 %vm283_vm0, %v281_v10  ;;  %v389_v32 = vld [vmem:[%s1127_s2] sm:$0xff]  ;;  %v390_v34 = vld [vmem:[%s1127_s2 + $0x8] sm:$0xff]  ;;  %v392_v37 = vld [vmem:[%s1127_s2 + $0x18] sm:$0xff] }
  0x18   : > { %799 = vmatpush.msrb.mxu3 %v387_v11  ;;  %509 = vmatpush.msra.mxu1 %v381_v17  ;;  %v395_v41 = vld [vmem:[%s1127_s2 + $0x30] sm:$0xff]  ;;  %v393_v43 = vld [vmem:[%s1127_s2 + $0x20] sm:$0xff]  ;;  %v396_v44 = vld [vmem:[%s1127_s2 + $0x38] sm:$0xff] }
  0x19   : > { %563 = vmatpush.msra.mxu2 %v380_v22  ;;  %403 = vperm.xlu0 %841, %v389_v32   ;;  %v394_v46 = vld [vmem:[%s1127_s2 + $0x28] sm:$0xff]  ;;  %v399_v51 = vld [vmem:[%s1127_s2 + $0x50] sm:$0xff]  ;;  %v397_v52 = vld [vmem:[%s1127_s2 + $0x40] sm:$0xff] }
  0x1a   : > { %800 = vmatpush.msrb.mxu3 %v385_v13  ;;  %510 = vmatpush.msra.mxu1 %v379_v21  ;;  %v398_v49 = vld [vmem:[%s1127_s2 + $0x48] sm:$0xff]  ;;  %v400_v56 = vld [vmem:[%s1127_s2 + $0x58] sm:$0xff] }
  0x1b   : > { %564 = vmatpush.msra.mxu2 %v378_v24  ;;  %413 = vperm.xlu1 %842, %v391_v35  }
  0x1c   : > { %801 = vmatpush.msrb.mxu3 %v383_v15  ;;  %511 = vmatpush.msra.mxu1 %v377_v23 }
  0x1d   : > { %565 = vmatpush.msra.mxu2 %v376_v26  ;;  %423 = vperm.xlu2 %843, %v393_v43  }
  0x1e   : > { %802 = vmatpush.msrb.mxu3 %v381_v17  ;;  %512 = vmatpush.msra.mxu1 %v375_v25 }
  0x1f   : > { %757 = vmatmul.msk.f32.gmra.mxu0 %vm283_vm0, %v272_v5  ;;  %767 = vmatmul.msk.f32.gmra.mxu3 %vm283_vm0, %v282_v20 }
  0x20   : > { %803 = vmatpush.msrb.mxu3 %v379_v21  ;;  %513 = vmatpush.msra.mxu1 %v373_v30 }
  0x21   : > { %566 = vmatpush.msra.mxu2 %v374_v31  ;;  %408 = vperm.xlu0 %841, %v390_v34  }
  0x22   : > { %804 = vmatpush.msrb.mxu3 %v377_v23 }
  0x23   : > { %418 = vperm.xlu1 %842, %v392_v37  }
  0x24   : > { %805 = vmatpush.msrb.mxu3 %v375_v25 }
  0x25   : > { %428 = vperm.xlu2 %843, %v394_v46  }
  0x26   : > { %806 = vmatpush.msrb.mxu3 %v373_v30 }
  0x27   : > { %758 = vmatmul.msk.f32.gmra.mxu0 %vm283_vm0, %v273_v6 }
  0x28   : > { %807 = vmatpush.msra.mxu3 %v388_v12 }
  0x29   : > { %433 = vperm.xlu0 %841, %v395_v41  }
  0x2a   : > { %808 = vmatpush.msra.mxu3 %v386_v14 }
  0x2b   : > { %438 = vperm.xlu1 %842, %v396_v44  }
  0x2c   : > { %809 = vmatpush.msra.mxu3 %v384_v16 }
  0x2d   : > { %443 = vperm.xlu2 %843, %v397_v52  }
  0x2e   : > { %810 = vmatpush.msra.mxu3 %v382_v19 }
  0x2f   : > { %759 = vmatmul.msk.f32.gmra.mxu0 %vm283_vm0, %v274_v7 }
  0x30   : > { %811 = vmatpush.msra.mxu3 %v380_v22 }
  0x31   : > { %448 = vperm.xlu0 %841, %v398_v49  }
  0x32   : > { %812 = vmatpush.msra.mxu3 %v378_v24 }
  0x33   : > { %453 = vperm.xlu1 %842, %v399_v51  }
  0x34   : > { %813 = vmatpush.msra.mxu3 %v376_v26 }
  0x35   : > { %458 = vperm.xlu2 %843, %v400_v56  }
  0x36   : > { %814 = vmatpush.msra.mxu3 %v374_v31 }
  0x37   : > { %760 = vmatmul.msk.f32.gmra.mxu0 %vm283_vm0, %v275_v8 }
  0x3f   : > { %761 = vmatmul.msk.f32.gmra.mxu0 %vm283_vm0, %v276_v9 }
  0x47   : > { %762 = vmatmul.msk.f32.gmra.mxu0 %vm283_vm0, %v277_v18 }
  0x4f   : > { %763 = vmatmul.msk.f32.gmra.mxu0 %vm283_vm0, %v278_v27 }
  0x57   : > { %764 = vmatmul.msk.f32.gmra.mxu0 %vm283_vm0, %v279_v28 }
  0x5f   : > { %765 = vmatmul.msk.f32.gmra.mxu0 %vm283_vm0, %v280_v29 }
  0x77   : > { %v424_v11 = vpop.permute.xlu2 %423 }
  0x7f   : > { %v429_v17 = vpop.permute.xlu2 %428 }
  0x87   : > { %v444_v32 = vpop.permute.xlu2 %443 }
  0x8b   : > { %v404_v57 = vpop.permute.xlu0 %403 }
  0x8d   : > { %v414_v1 = vpop.permute.xlu1 %413 }
  0x8f   : > { %v459_v44 = vpop.permute.xlu2 %458 }
  0x93   : > { %v409_v61 = vpop.permute.xlu0 %408 }
  0x94   : > { %v337_v36 = vpop.f32.mrf.mxu0 }
  0x95   : > { %768 = vmatmul.msk.f32.vlgmr.msra.gmra.mxu1 %vm461_vm1, %v337_v36  ;;  %780 = vmatmul.msk.f32.vlgmr.msra.gmra.mxu2 %vm461_vm1, %v337_v36  ;;  %v419_v7 = vpop.permute.xlu1 %418 }
  0x9a   : > { %v367_v54 = vpop.f32.mrf.mxu3 }
  0x9b   : > { %v434_v22 = vpop.permute.xlu0 %433 }
  0x9c   : > { %v340_v38 = vpop.f32.mrf.mxu0 }
  0x9d   : > { %769 = vmatmul.msk.f32.gmra.mxu1 %vm461_vm1, %v340_v38  ;;  %781 = vmatmul.msk.f32.gmra.mxu2 %vm461_vm1, %v340_v38  ;;  %v439_v27 = vpop.permute.xlu1 %438 }
  0xa2   : > { %v370_v55 = vpop.f32.mrf.mxu3 }
  0xa3   : > { %v449_v38 = vpop.permute.xlu0 %448 }
  0xa4   : > { %v343_v39 = vpop.f32.mrf.mxu0 }
  0xa5   : > { %770 = vmatmul.msk.f32.gmra.mxu1 %vm461_vm1, %v343_v39  ;;  %782 = vmatmul.msk.f32.gmra.mxu2 %vm461_vm1, %v343_v39  ;;  %v454_v41 = vpop.permute.xlu1 %453 }
  0xac   : > { %v346_v40 = vpop.f32.mrf.mxu0 }
  0xad   : > { %771 = vmatmul.msk.f32.gmra.mxu1 %vm461_vm1, %v346_v40  ;;  %783 = vmatmul.msk.f32.gmra.mxu2 %vm461_vm1, %v346_v40 }
  0xb4   : > { %v349_v42 = vpop.f32.mrf.mxu0 }
  0xb5   : > { %772 = vmatmul.msk.f32.gmra.mxu1 %vm461_vm1, %v349_v42  ;;  %784 = vmatmul.msk.f32.gmra.mxu2 %vm461_vm1, %v349_v42 }
  0xbc   : > { %v352_v45 = vpop.f32.mrf.mxu0 }
  0xbd   : > { %773 = vmatmul.msk.f32.gmra.mxu1 %vm461_vm1, %v352_v45  ;;  %785 = vmatmul.msk.f32.gmra.mxu2 %vm461_vm1, %v352_v45 }
  0xc4   : > { %v355_v47 = vpop.f32.mrf.mxu0 }
  0xc5   : > { %774 = vmatmul.msk.f32.gmra.mxu1 %vm461_vm1, %v355_v47  ;;  %786 = vmatmul.msk.f32.gmra.mxu2 %vm461_vm1, %v355_v47 }
  0xcc   : > { %v358_v48 = vpop.f32.mrf.mxu0 }
  0xcd   : > { %775 = vmatmul.msk.f32.gmra.mxu1 %vm461_vm1, %v358_v48  ;;  %787 = vmatmul.msk.f32.gmra.mxu2 %vm461_vm1, %v358_v48 }
  0xd4   : > { %v361_v50 = vpop.f32.mrf.mxu0 }
  0xd5   : > { %776 = vmatmul.msk.f32.gmra.mxu1 %vm461_vm1, %v361_v50  ;;  %788 = vmatmul.msk.f32.gmra.mxu2 %vm461_vm1, %v361_v50 }
  0xdc   : > { %v364_v53 = vpop.f32.mrf.mxu0 }
  0xdd   : > { %777 = vmatmul.msk.f32.vlgmr.msrb.gmra.mxu3 %vm461_vm1, %v364_v53 }
  0xe5   : > { %778 = vmatmul.msk.f32.gmra.mxu3 %vm461_vm1, %v367_v54 }
  0xed   : > { %779 = vmatmul.msk.f32.gmra.mxu3 %vm461_vm1, %v370_v55 }
  0xf5   : > { %789 = vmatmul.msk.f32.vlgmr.msra.gmra.mxu3 %vm461_vm1, %v364_v53 }
  0xfd   : > { %790 = vmatmul.msk.f32.gmra.mxu3 %vm461_vm1, %v367_v54 }
 0x105   : > { %791 = vmatmul.msk.f32.gmra.mxu3 %vm461_vm1, %v370_v55 }
 0x112   : > { %v515_v58 = vpop.f32.mrf.mxu1 }
 0x113   : > { %v516_v59 = vadd.f32 %v515_v58, %v404_v57 }
 0x115   : > { %604 = vst [vmem:[%s1078_s14] sm:$0xff] %v516_v59 }
 0x118   : > { %v568_v60 = vpop.f32.mrf.mxu2 }
 0x119   : > { %v569_v62 = vadd.f32 %v568_v60, %v404_v57 }
 0x11a   : > { %v518_v63 = vpop.f32.mrf.mxu1 }
 0x11b   : > { %606 = vst.msk [vmem:[%s1078_s14 + $0x8] sm:$0xff] %vm605_vm2, %v569_v62  ;;  %v519_v0 = vadd.f32 %v518_v63, %v409_v61 }
 0x11d   : > { %607 = vst [vmem:[%s1078_s14 + $0x10] sm:$0xff] %v519_v0 }
 0x120   : > { %v571_v2 = vpop.f32.mrf.mxu2 }
 0x121   : > { %v572_v3 = vadd.f32 %v571_v2, %v409_v61 }
 0x122   : > { %v521_v4 = vpop.f32.mrf.mxu1 }
 0x123   : > { %608 = vst.msk [vmem:[%s1078_s14 + $0x18] sm:$0xff] %vm605_vm2, %v572_v3  ;;  %v522_v5 = vadd.f32 %v521_v4, %v414_v1 }
 0x125   : > { %609 = vst [vmem:[%s1078_s14 + $0x20] sm:$0xff] %v522_v5 }
 0x128   : > { %v574_v6 = vpop.f32.mrf.mxu2 }
 0x129   : > { %v575_v8 = vadd.f32 %v574_v6, %v414_v1 }
 0x12a   : > { %v524_v9 = vpop.f32.mrf.mxu1 }
 0x12b   : > { %610 = vst.msk [vmem:[%s1078_s14 + $0x28] sm:$0xff] %vm605_vm2, %v575_v8  ;;  %v525_v10 = vadd.f32 %v524_v9, %v419_v7 }
 0x12d   : > { %611 = vst [vmem:[%s1078_s14 + $0x30] sm:$0xff] %v525_v10 }
 0x130   : > { %v577_v12 = vpop.f32.mrf.mxu2 }
 0x131   : > { %v578_v13 = vadd.f32 %v577_v12, %v419_v7 }
 0x132   : > { %v527_v14 = vpop.f32.mrf.mxu1 }
 0x133   : > { %612 = vst.msk [vmem:[%s1078_s14 + $0x38] sm:$0xff] %vm605_vm2, %v578_v13  ;;  %v528_v15 = vadd.f32 %v527_v14, %v424_v11 }
 0x135   : > { %613 = vst [vmem:[%s1078_s14 + $0x40] sm:$0xff] %v528_v15 }
 0x138   : > { %v580_v16 = vpop.f32.mrf.mxu2 }
 0x139   : > { %v581_v18 = vadd.f32 %v580_v16, %v424_v11 }
 0x13a   : > { %v530_v19 = vpop.f32.mrf.mxu1 }
 0x13b   : > { %614 = vst.msk [vmem:[%s1078_s14 + $0x48] sm:$0xff] %vm605_vm2, %v581_v18  ;;  %v531_v20 = vadd.f32 %v530_v19, %v429_v17 }
 0x13d   : > { %615 = vst [vmem:[%s1078_s14 + $0x50] sm:$0xff] %v531_v20 }
 0x140   : > { %v583_v21 = vpop.f32.mrf.mxu2 }
 0x141   : > { %v584_v23 = vadd.f32 %v583_v21, %v429_v17 }
 0x142   : > { %v533_v24 = vpop.f32.mrf.mxu1 }
 0x143   : > { %616 = vst.msk [vmem:[%s1078_s14 + $0x58] sm:$0xff] %vm605_vm2, %v584_v23  ;;  %v534_v25 = vadd.f32 %v533_v24, %v434_v22 }
 0x145   : > { %617 = vst [vmem:[%s1078_s14 + $0x60] sm:$0xff] %v534_v25 }
 0x148   : > { %v586_v26 = vpop.f32.mrf.mxu2 }
 0x149   : > { %v587_v28 = vadd.f32 %v586_v26, %v434_v22 }
 0x14a   : > { %v536_v29 = vpop.f32.mrf.mxu1 }
 0x14b   : > { %618 = vst.msk [vmem:[%s1078_s14 + $0x68] sm:$0xff] %vm605_vm2, %v587_v28  ;;  %v537_v30 = vadd.f32 %v536_v29, %v439_v27 }
 0x14d   : > { %619 = vst [vmem:[%s1078_s14 + $0x70] sm:$0xff] %v537_v30 }
 0x150   : > { %v589_v31 = vpop.f32.mrf.mxu2 }
 0x151   : > { %v590_v33 = vadd.f32 %v589_v31, %v439_v27 }
 0x152   : > { %v539_v34 = vpop.f32.mrf.mxu1 }
 0x153   : > { %620 = vst.msk [vmem:[%s1078_s14 + $0x78] sm:$0xff] %vm605_vm2, %v590_v33  ;;  %v540_v35 = vadd.f32 %v539_v34, %v444_v32 }
 0x155   : > { %621 = vst [vmem:[%s1078_s14 + $0x80] sm:$0xff] %v540_v35 }
 0x158   : > { %v592_v36 = vpop.f32.mrf.mxu2 }
 0x159   : > { %v593_v37 = vadd.f32 %v592_v36, %v444_v32 }
 0x15b   : > { %622 = vst.msk [vmem:[%s1078_s14 + $0x88] sm:$0xff] %vm605_vm2, %v593_v37 }
 0x160   : > { %v542_v39 = vpop.f32.mrf.mxu3 }
 0x161   : > { %v543_v40 = vadd.f32 %v542_v39, %v449_v38 }
 0x163   : > { %623 = vst [vmem:[%s1078_s14 + $0x90] sm:$0xff] %v543_v40 }
 0x168   : > { %v545_v42 = vpop.f32.mrf.mxu3 }
 0x169   : > { %v546_v43 = vadd.f32 %v545_v42, %v454_v41 }
 0x16b   : > { %625 = vst [vmem:[%s1078_s14 + $0xa0] sm:$0xff] %v546_v43 }
 0x170   : > { %v548_v45 = vpop.f32.mrf.mxu3 }
 0x171   : > { %v549_v46 = vadd.f32 %v548_v45, %v459_v44 }
 0x173   : > { %627 = vst [vmem:[%s1078_s14 + $0xb0] sm:$0xff] %v549_v46 }
 0x178   : > { %v595_v47 = vpop.f32.mrf.mxu3 }
 0x179   : > { %v596_v48 = vadd.f32 %v595_v47, %v449_v38 }
 0x17b   : > { %624 = vst.msk [vmem:[%s1078_s14 + $0x98] sm:$0xff] %vm605_vm2, %v596_v48 }
 0x180   : > { %v598_v49 = vpop.f32.mrf.mxu3 }
 0x181   : > { %v599_v50 = vadd.f32 %v598_v49, %v454_v41 }
 0x183   : > { %626 = vst.msk [vmem:[%s1078_s14 + $0xa8] sm:$0xff] %vm605_vm2, %v599_v50 }
 0x188   : > { %v601_v51 = vpop.f32.mrf.mxu3 }
 0x189   : > { %v602_v52 = vadd.f32 %v601_v51, %v459_v44 }
 0x18b   : > { %628 = vst.msk [vmem:[%s1078_s14 + $0xb8] sm:$0xff] %vm605_vm2, %v602_v52 }
 0x18c PF: > { %s14_s17 = sadd.s32 1, %s866_s17   ;;  %s1130_s15 = smov %s862_s16 }
 0x18d   : > { %p11_p5 = scmp.ge.s32.totalorder %s14_s17, 4   ;;  %s1131_s16 = smov %s1133_s18 }
 0x18f   :  { %13 = sbr.rel (!%p11_p5) target bundleno = 2 (0x2), region = 72 }

</bundles_post_ra>
